<compile_context>
chip_gen: v7x
topology: tpu7x:2x2x1
jax: 0.10.0
libtpu: 0.0.40
codegen_flags: <defaults>
</compile_context>

<pallas_src>
import jax
import jax.numpy as jnp
from jax.experimental import pallas as pl
from jax.experimental.pallas import tpu as pltpu


# ---------------------------------------------------------------------------
# Kernels
# ---------------------------------------------------------------------------
def _softplus_sqrt_f32(pre_var_f32):
    # Numerically stable softplus: max(x, 0) + log1p(exp(-|x|)), then sqrt.
    sp = jnp.maximum(pre_var_f32, 0.0) + jnp.log1p(jnp.exp(-jnp.abs(pre_var_f32)))
    return jnp.sqrt(sp)


def _split_kernel(x_ref, mean_ref, scale_ref):
    """Fast path (A % 128 == 0): one (tile_b, 2A) block, aligned in-kernel split."""
    a = mean_ref.shape[-1]
    # Static, 128-aligned column slices: free views, no cross-lane relayout.
    mean_ref[...] = x_ref[:, :a].astype(mean_ref.dtype)
    pre_var = x_ref[:, a:].astype(jnp.float32)
    scale_ref[...] = _softplus_sqrt_f32(pre_var).astype(scale_ref.dtype)


def _slab_kernel(x_ref, scale_ref):
    """Fallback: pure elementwise softplus+sqrt on a lane-dense (rows, 128) slab."""
    pre_var = x_ref[...].astype(jnp.float32)
    scale_ref[...] = _softplus_sqrt_f32(pre_var).astype(scale_ref.dtype)


# ---------------------------------------------------------------------------
# Tiling helpers
# ---------------------------------------------------------------------------
def _tpu_vmem_budget_bytes():
    """~25% of physical VMEM: 32 MiB on v5e/v6e (128 MiB), 16 MiB on v7x (64 MiB)."""
    phys = 64 * 1024 * 1024  # conservative default (v7x per-TC physical VMEM)
    try:
        info = pltpu.get_tpu_info()
        cap = getattr(info, "vmem_capacity_bytes", None)
        if cap:
            phys = int(cap)
    except Exception:
        pass
    return phys // 4


def _pick_tile_rows(total_rows, bytes_per_row, vmem_budget):
    """Largest sublane-aligned row tile that fits the VMEM budget.

    Accounts for 2x double buffering plus ~25% headroom for f32 temporaries.
    Does NOT force multiple grid steps: on single-TC chips a batch that fits
    one tile should run in one step (no extra ~0.35 us/step overhead).
    """
    usable = (vmem_budget * 3) // 4
    max_rows = max(8, usable // (2 * max(bytes_per_row, 1)))
    padded = -(-total_rows // 8) * 8
    tile = min(max_rows, padded)
    return max(8, (tile // 8) * 8)


# ---------------------------------------------------------------------------
# Wrapper
# ---------------------------------------------------------------------------
def gaussian_head_with_diagonal_covariance(mean_and_var, *, tile_b=None,
                                           out_dtype=None):
    """Pallas equivalent of GaussianHeadWithDiagonalCovariance.forward.

    Args:
        mean_and_var: (B, 2*A) array, columns = [mean | pre_var].
    Returns:
        dict with 'loc' (B, A), 'scale' (B, A) = sqrt(softplus(pre_var)),
        and 'reinterpreted_batch_ndims' = 1 (Independent over the last axis).
    """
    assert mean_and_var.ndim == 2
    b, two_a = mean_and_var.shape
    assert two_a % 2 == 0
    a = two_a // 2

    in_dtype = jnp.dtype(mean_and_var.dtype)
    out_dtype = in_dtype if out_dtype is None else jnp.dtype(out_dtype)
    in_size = in_dtype.itemsize
    out_size = out_dtype.itemsize
    vmem_budget = _tpu_vmem_budget_bytes()

    if a % 128 == 0:
        # ---- Fast path: contiguous (tile_b, 2A) input, aligned in-kernel split.
        row_bytes = two_a * in_size + two_a * out_size
        if tile_b is None:
            tile_b = _pick_tile_rows(b, row_bytes, vmem_budget)
        grid = (pl.cdiv(b, tile_b),)
        cost = pl.CostEstimate(
            flops=6 * b * a,
            transcendentals=3 * b * a,
            bytes_accessed=b * two_a * in_size + 2 * b * a * out_size,
        )
        mean, scale = pl.pallas_call(
            _split_kernel,
            out_shape=(
                jax.ShapeDtypeStruct((b, a), out_dtype),
                jax.ShapeDtypeStruct((b, a), out_dtype),
            ),
            grid_spec=pltpu.PrefetchScalarGridSpec(
                num_scalar_prefetch=0,
                grid=grid,
                in_specs=[pl.BlockSpec((tile_b, two_a), lambda i: (i, 0))],
                out_specs=[
                    pl.BlockSpec((tile_b, a), lambda i: (i, 0)),
                    pl.BlockSpec((tile_b, a), lambda i: (i, 0)),
                ],
            ),
            compiler_params=pltpu.CompilerParams(
                dimension_semantics=("parallel",),
                vmem_limit_bytes=int(vmem_budget),
            ),
            cost_estimate=cost,
        )(mean_and_var)
        return {"loc": mean, "scale": scale, "reinterpreted_batch_ndims": 1}

    # ---- Lane-dense fallback (A not a multiple of 128, e.g. RL heads A=2..64).
    # Split in the wrapper with XLA slices; loc needs no kernel copy at all.
    mean = mean_and_var[:, :a].astype(out_dtype)
    pre_var = mean_and_var[:, a:]

    lane = 128
    n = b * a
    rows = -(-n // lane)
    rows = -(-rows // 8) * 8                      # sublane-aligned slab rows
    pad = rows * lane - n
    slab = jnp.pad(pre_var.reshape(-1), (0, pad)).reshape(rows, lane)

    row_bytes = lane * (in_size + out_size)
    tile_r = _pick_tile_rows(rows, row_bytes, vmem_budget)
    tile_r = min(tile_r, rows)
    grid = (pl.cdiv(rows, tile_r),)
    cost = pl.CostEstimate(
        flops=5 * n,
        transcendentals=3 * n,
        bytes_accessed=n * (in_size + out_size),
    )
    scale_slab = pl.pallas_call(
        _slab_kernel,
        out_shape=jax.ShapeDtypeStruct((rows, lane), out_dtype),
        grid_spec=pltpu.PrefetchScalarGridSpec(
            num_scalar_prefetch=0,
            grid=grid,
            in_specs=[pl.BlockSpec((tile_r, lane), lambda i: (i, 0))],
            out_specs=pl.BlockSpec((tile_r, lane), lambda i: (i, 0)),
        ),
        compiler_params=pltpu.CompilerParams(
            dimension_semantics=("parallel",),
            vmem_limit_bytes=int(vmem_budget),
        ),
        cost_estimate=cost,
    )(slab)
    scale = scale_slab.reshape(-1)[:n].reshape(b, a)

    # TODO(synk): torch.distributions.Independent(Normal(...), 1) has no Pallas
    # equivalent; we return its parameters (loc, scale) + reinterpreted ndims.
    return {"loc": mean, "scale": scale, "reinterpreted_batch_ndims": 1}


# ---------------------------------------------------------------------------
# Reference + tests
# ---------------------------------------------------------------------------
def _reference(mean_and_var):
    a = mean_and_var.shape[1] // 2
    mean = mean_and_var[:, :a]
    pre_var = mean_and_var[:, a:]
    return mean, jnp.sqrt(jax.nn.softplus(pre_var.astype(jnp.float32)))


if __name__ == "__main__":
    key = jax.random.PRNGKey(0)
    # (batch, action_dim, dtype): fast aligned path, partial batch block,
    # lane-dense slab fallback (A < 128), and a bf16 case (f32 internals).
    cases = [
        (8, 128, jnp.float32),
        (5, 128, jnp.float32),
        (16, 32, jnp.float32),
        (8, 128, jnp.bfloat16),
    ]
    for i, (B, A, dt) in enumerate(cases):
        x = jax.random.normal(jax.random.fold_in(key, i), (B, 2 * A),
                              dtype=jnp.float32).astype(dt)
        out = gaussian_head_with_diagonal_covariance(x)
        jax.block_until_ready(out["loc"])
        jax.block_until_ready(out["scale"])

        ref_loc, ref_scale = _reference(x)
        assert out["loc"].shape == (B, A) and out["scale"].shape == (B, A)
        atol = 1e-5 if dt == jnp.float32 else 2e-2
        assert jnp.allclose(out["loc"].astype(jnp.float32),
                            ref_loc.astype(jnp.float32), atol=atol)
        assert jnp.allclose(out["scale"].astype(jnp.float32),
                            ref_scale, atol=atol)

    print("KERNEL_OK")
</pallas_src>

<mosaic_0001>
module attributes {stable_mosaic.version = 11 : i64} {
  func.func @_split_kernel(%arg0: i32, %arg1: memref<8x256xf32, #tpu.memory_space<vmem>>, %arg2: memref<8x128xf32, #tpu.memory_space<vmem>>, %arg3: memref<8x128xf32, #tpu.memory_space<vmem>>) attributes {dimension_semantics = [#tpu.dimension_semantics<parallel>], iteration_bounds = array<i64: 1>, scalar_prefetch = 0 : i64, scratch_operands = 0 : i64, tpu.core_type = #tpu.core_type<tc>, window_params = [{transform_indices = @transform_0, window_bounds = array<i64: 8, 256>}, {transform_indices = @transform_1, window_bounds = array<i64: 8, 128>}, {transform_indices = @transform_2, window_bounds = array<i64: 8, 128>}]} {
    %c0 = arith.constant 0 : index
    %c0_0 = arith.constant 0 : index
    %0 = vector.load %arg1[%c0, %c0_0] : memref<8x256xf32, #tpu.memory_space<vmem>>, vector<8x128xf32>
    %c0_1 = arith.constant 0 : index
    %c0_2 = arith.constant 0 : index
    %1 = vector.load %arg2[%c0_1, %c0_2] : memref<8x128xf32, #tpu.memory_space<vmem>>, vector<8x128xf32>
    tpu.vector_store %arg2[%c0_1, %c0_2], %0 {strides = array<i32>} : memref<8x128xf32, #tpu.memory_space<vmem>>, vector<8x128xf32>,
    %c0_3 = arith.constant 0 : index
    %c128 = arith.constant 128 : index
    %2 = vector.load %arg1[%c0_3, %c128] : memref<8x256xf32, #tpu.memory_space<vmem>>, vector<8x128xf32>
    %cst = arith.constant 0.000000e+00 : f32
    %3 = vector.broadcast %cst : f32 to vector<8x128xf32>
    %4 = arith.maximumf %2, %3 : vector<8x128xf32>
    %5 = math.absf %2 : vector<8x128xf32>
    %cst_4 = arith.constant 0.000000e+00 : f32
    %6 = vector.broadcast %cst_4 : f32 to vector<8x128xf32>
    %7 = arith.subf %6, %5 : vector<8x128xf32>
    %8 = math.exp %7 : vector<8x128xf32>
    %9 = math.log1p %8 : vector<8x128xf32>
    %10 = arith.addf %4, %9 : vector<8x128xf32>
    %11 = math.sqrt %10 : vector<8x128xf32>
    %c0_5 = arith.constant 0 : index
    %c0_6 = arith.constant 0 : index
    %12 = vector.load %arg3[%c0_5, %c0_6] : memref<8x128xf32, #tpu.memory_space<vmem>>, vector<8x128xf32>
    tpu.vector_store %arg3[%c0_5, %c0_6], %11 {strides = array<i32>} : memref<8x128xf32, #tpu.memory_space<vmem>>, vector<8x128xf32>,
    return
  }
  func.func @transform_0(%arg0: i32) -> (i32, i32) {
    %c0_i32 = arith.constant 0 : i32
    %c0_i32_0 = arith.constant 0 : i32
    return %arg0, %c0_i32 : i32, i32
  }
  func.func @transform_1(%arg0: i32) -> (i32, i32) {
    %c0_i32 = arith.constant 0 : i32
    %c0_i32_0 = arith.constant 0 : i32
    return %arg0, %c0_i32 : i32, i32
  }
  func.func @transform_2(%arg0: i32) -> (i32, i32) {
    %c0_i32 = arith.constant 0 : i32
    %c0_i32_0 = arith.constant 0 : i32
    return %arg0, %c0_i32 : i32, i32
  }
}

</mosaic_0001>

<bundles_post_ra>
// kernel: tpu_custom_call.1
= control target key start
LH: loop header
LB: loop body
LE: loop exit
PB: predicated region body
PF: predicated region fallthrough
CT: control target
= control target key end

     0   :  { %8 = vsyncpa [#allocation3], 0  ;;  %s214_s0 = inlined_call_operand.hbm [shape: f32[8,256], index: 0, kind: input, shape index: {}]   ;;  %s215_s1 = inlined_call_operand.hbm [shape: f32[8,128], index: 1, kind: output, shape index: {0}]   ;;  %s216_s2 = inlined_call_operand.hbm [shape: f32[8,128], index: 2, kind: output, shape index: {1}]  }
   0x1   :  { %9 = vsyncpa [#allocation4], 0 }
   0x2   :  { %10 = vsyncpa [#allocation7], 0  ;;  %s160_s9 = smov [#allocation2]   ;;  %s88_s13 = scalar_lea.hbm %s214_s0, 256 }
   0x3   :  { %s17_s10 = sshll.u32 %s160_s9, 4  ;;  %p89_p0 = scmp.ne.s32.totalorder %s214_s0, %s88_s13  ;;  %s18_s10 = int_to_ptr.vmem [resolvable:$true] %s17_s10 }
   0x4   :  { %p92_p1 = scmp.lt.u32.totalorder %s88_s13, %s214_s0 }
   0x6   :  { %p94_p2 = pnand %p92_p1, %p89_p0 }
   0x8   :  { %97 = shalt.err (!%p94_p2)
}
   0x9   :  { %s98_s18 = scalar_lea.vmem %s18_s10, 256  ;;  %p103_p4 = scmp.lt.s32.totalorder %s18_s10, %s18_s10 }
   0xa   :  { %p99_p3 = scmp.ne.s32.totalorder %s18_s10, %s98_s18  ;;  %p104_p5 = scmp.lt.s32.totalorder %s98_s18, %s98_s18 }
   0xc   :  { %p105_p6 = por %p104_p5, %p103_p4 }
   0xe   :  { %p106_p7 = pnand %p105_p6, %p99_p3 }
  0x10   :  { %109 = shalt.err (!%p106_p7)
}
  0x11   :  { %20 = dma.hbm_to_vmem [thread:$0]  %s214_s0, 256, %s18_s10, [#allocation3]  }
  0x12   :  { %154 = dma.done.wait [#allocation3], 256  }
  0x13   :  { %155 = vsyncadd [#allocation3], 4294967040  ;;  %s161_s21 = smov [#allocation5]   ;;  %v24_v0 = vld [vmem:[#allocation2] sm:$0xff]  ;;  %v26_v1 = vld [vmem:[#allocation2 + $0x8] sm:$0xff] }
  0x14   :  { %s56_s22 = sshll.u32 %s161_s21, 4  ;;  %25 = vst [vmem:[#allocation5] sm:$0xff] %v24_v0  ;;  %v28_v2 = vand.u32 2147483647, %v26_v1  ;;  %s57_s22 = int_to_ptr.vmem [resolvable:$true] %s56_s22 }
  0x15   :  { %s110_s23 = scalar_lea.vmem %s57_s22, 128  ;;  %p115_p9 = scmp.lt.s32.totalorder %s57_s22, %s57_s22 }
  0x16   :  { %p111_p8 = scmp.ne.s32.totalorder %s57_s22, %s110_s23  ;;  %p116_p10 = scmp.lt.s32.totalorder %s110_s23, %s110_s23 }
  0x18   :  { %p117_p11 = por %p116_p10, %p115_p9 }
  0x1a   :  { %p118_p12 = pnand %p117_p11, %p111_p8 }
  0x1c   :  { %121 = shalt.err (!%p118_p12)
}
  0x1d   :  { %s122_s0 = scalar_lea.hbm %s215_s1, 128 }
  0x1e   :  { %p123_p13 = scmp.ne.s32.totalorder %s215_s1, %s122_s0  ;;  %p126_p0 = scmp.lt.u32.totalorder %s122_s0, %s215_s1 }
  0x20   :  { %p128_p1 = pnand %p126_p0, %p123_p13 }
  0x22   :  { %131 = shalt.err (!%p128_p1)
}
  0x23   :  { %59 = dma.vmem_to_hbm [thread:$0]  %s57_s22, 128, %s215_s1, [#allocation4]   ;;  %v29_v3 = vsub.f32 0.0, %v28_v2  ;;  %v27_v12 = vmax.f32 %v26_v1, 0.0 }
  0x24   :  { %s162_s1 = smov [#allocation6]  }
  0x25   :  { %v30_v4 = vmul.f32 1.442695, %v29_v3  ;;  %s66_s4 = sshll.u32 %s162_s1, 4  ;;  %s67_s4 = int_to_ptr.vmem [resolvable:$true] %s66_s4 }
  0x26   :  { %s132_s5 = scalar_lea.vmem %s67_s4, 128  ;;  %p137_p3 = scmp.lt.s32.totalorder %s67_s4, %s67_s4 }
  0x27   :  { %82 = vpow2.f32 %v30_v4  ;;  %p133_p2 = scmp.ne.s32.totalorder %s67_s4, %s132_s5  ;;  %p138_p4 = scmp.lt.s32.totalorder %s132_s5, %s132_s5 }
  0x29   :  { %p139_p5 = por %p138_p4, %p137_p3 }
  0x2b   :  { %p140_p6 = pnand %p139_p5, %p133_p2 }
  0x31   :  { %v83_v5 = vpop.eup %82 }
  0x32   :  { %v32_v6 = vadd.f32 1.0, %v83_v5  ;;  %v35_v7 = vmul.f32 -0.5, %v83_v5  ;;  %v38_v9 = vand.u32 2147483647, %v83_v5 }
  0x34   :  { %84 = vlog2.f32 %v32_v6  ;;  %v36_v8 = vadd.f32 1.0, %v35_v7  ;;  %vm39_vm0 = vcmp.lt.f32.partialorder %v38_v9, 0.0004427343 }
  0x36   :  { %v37_v10 = vmul.f32 %v83_v5, %v36_v8 }
  0x3e   :  { %v85_v11 = vpop.eup %84 }
  0x3f   :  { %v34_v13 = vmul.f32 0.6931472, %v85_v11 }
  0x41   :  { %v40_v14 = vsel %vm39_vm0, %v37_v10, %v34_v13 }
  0x42   :  { %v41_v15 = vadd.f32 %v40_v14, %v27_v12 }
  0x44   :  { %86 = vrsqrt.f32 %v41_v15  ;;  %vm44_vm1 = vcmp.eq.f32.partialorder %v41_v15, inf  ;;  %v47_v17 = vand.u32 2147483648, %v41_v15  ;;  %vm46_vm2 = vcmp.eq.f32.partialorder %v41_v15, 0.0 }
  0x4e   :  { %v87_v16 = vpop.eup %86 }
  0x4f   :  { %v43_v18 = vmul.f32 %v87_v16, %v41_v15 }
  0x51   :  { %v45_v19 = vsel %vm44_vm1, %v41_v15, %v43_v18 }
  0x52   :  { %v48_v20 = vsel %vm46_vm2, %v47_v17, %v45_v19 }
  0x53   :  { %49 = vst [vmem:[#allocation6] sm:$0xff] %v48_v20 }
  0x54   :  { %143 = shalt.err (!%p140_p6)
}
  0x55   :  { %s144_s8 = scalar_lea.hbm %s216_s2, 128 }
  0x56   :  { %p145_p7 = scmp.ne.s32.totalorder %s216_s2, %s144_s8  ;;  %p148_p8 = scmp.lt.u32.totalorder %s144_s8, %s216_s2 }
  0x58   :  { %p150_p9 = pnand %p148_p8, %p145_p7 }
  0x5a   :  { %153 = shalt.err (!%p150_p9)
}
  0x5b   :  { %69 = dma.vmem_to_hbm [thread:$0]  %s67_s4, 128, %s216_s2, [#allocation7]  }
  0x5c   :  { %156 = dma.done.wait [#allocation4], 128  }
  0x5d   :  { %157 = vsyncadd [#allocation4], 4294967168 }
  0x5e   :  { %158 = dma.done.wait [#allocation7], 128  }
  0x5f   :  { %159 = vsyncadd [#allocation7], 4294967168 }
  0x60   :  { %76 = vsyncpa [#allocation3], 1 }
  0x61   :  { %77 = vsyncpa [#allocation4], 1 }
  0x62   :  { %78 = vsyncpa [#allocation7], 1 }

</bundles_post_ra>
